<compile_context>
chip_gen: v6e
topology: v6e:2x2x1
jax: 0.10.0
libtpu: 0.0.40
codegen_flags: <defaults>
</compile_context>

<pallas_src>
import functools

import jax
import jax.numpy as jnp
from jax.experimental import pallas as pl
from jax.experimental.pallas import tpu as pltpu


def _round_up(x, m):
    return ((x + m - 1) // m) * m


_BLOCK_ROWS = 8       # sublane-dense blocks
_MAX_TN = 1024        # lanes per block for large token counts


def _lookup_kernel(rm_ref, ids_ref, o_ref, *, num_vocab):
    # rm_ref : SMEM (V,) float32   per-id pooled value (mean over channels)
    # ids_ref: VMEM (8, TN) int32  token ids (pad lanes hold 0, sliced off later)
    # o_ref  : VMEM (8, TN) float  pooled output block
    ids = ids_ref[...]
    # Unrolled VPU lookup: 21 compare+select ops per output vreg.
    out = jnp.full(ids.shape, rm_ref[0], dtype=jnp.float32)
    for v in range(1, num_vocab):
        out = jnp.where(ids == v, rm_ref[v], out)
    o_ref[...] = out.astype(o_ref.dtype)


def tox21_embedding_forward(ids, weight):
    """ids: int [B, L]; weight: [V, C] embedding table.  Returns [B, L]."""
    b, l = ids.shape
    v, c = weight.shape
    n = b * l

    # Hoist GlobalAvgPool1d into the table: out[b, l] = row_mean[ids[b, l]].
    row_mean = weight.astype(jnp.float32).mean(axis=1)          # (V,), 1/C folded in

    # Tile the token axis as sublane/lane-dense (8, TN) blocks.
    tn = min(_MAX_TN, max(128, _round_up(pl.cdiv(n, _BLOCK_ROWS), 128)))
    block = _BLOCK_ROWS * tn
    n_pad = _round_up(n, block)
    rows = n_pad // tn
    grid = (rows // _BLOCK_ROWS,)

    ids_flat = ids.astype(jnp.int32).reshape(-1)
    ids_padded = (
        jnp.zeros((n_pad,), dtype=jnp.int32).at[:n].set(ids_flat).reshape(rows, tn)
    )

    out = pl.pallas_call(
        functools.partial(_lookup_kernel, num_vocab=v),
        out_shape=jax.ShapeDtypeStruct((rows, tn), weight.dtype),
        grid=grid,
        in_specs=[
            # Tiny (V,) pooled table: whole array in SMEM, no pipelining machinery.
            pl.BlockSpec(memory_space=pltpu.MemorySpace.SMEM),
            # Streamed, double-buffered ids blocks.
            pl.BlockSpec((_BLOCK_ROWS, tn), lambda t: (t, 0)),
        ],
        out_specs=pl.BlockSpec((_BLOCK_ROWS, tn), lambda t: (t, 0)),
        compiler_params=pltpu.CompilerParams(
            dimension_semantics=("parallel",)),   # independent tiles -> megacore on v7x
    )(row_mean, ids_padded)

    return out.reshape(-1)[:n].reshape(b, l)


class Tox21Embedding:
    """JAX/Pallas mirror of the PyTorch Tox21Embedding module.

    Holds the embedding table; __call__ takes the integer id tensor (the
    `value.x` field) and returns the flattened pooled features [B, L].
    """
    # TODO(synk): the PyG-style `value` container mutation (value.x = ...) is
    # handled by the caller; this class returns the new feature tensor.

    def __init__(self, seq_len=21, out_channels=64, key=None):
        if key is None:
            key = jax.random.PRNGKey(0)
        # nn.Embedding default init: N(0, 1)
        self.weight = jax.random.normal(
            key, (seq_len, out_channels), dtype=jnp.float32)

    def __call__(self, x):
        return tox21_embedding_forward(x, self.weight)


if __name__ == "__main__":
    key = jax.random.PRNGKey(0)
    k_w, k_x, k_x2 = jax.random.split(key, 3)

    # Small shapes consistent with the module: batch=4, 21 tokens per example,
    # vocab=21, embedding dim=64.
    B, L, V, C = 4, 21, 21, 64
    ids = jax.random.randint(k_x, (B, L), 0, V, dtype=jnp.int32)

    module = Tox21Embedding(seq_len=V, out_channels=C, key=k_w)
    out = module(ids)
    out = jax.block_until_ready(out)

    # Reference in plain JAX: embed -> mean over the channel axis -> flatten.
    ref = jnp.take(module.weight, ids, axis=0).mean(axis=-1)   # [B, L]
    assert out.shape == (B, L), out.shape
    assert jnp.allclose(out, ref, atol=1e-5, rtol=1e-5)

    # Second check with enough tokens to exercise a multi-step (megacore-able)
    # grid with the large (8, 1024) blocks.
    B2, L2 = 16, 600
    ids2 = jax.random.randint(k_x2, (B2, L2), 0, V, dtype=jnp.int32)
    out2 = jax.block_until_ready(module(ids2))
    ref2 = jnp.take(module.weight, ids2, axis=0).mean(axis=-1)
    assert out2.shape == (B2, L2), out2.shape
    assert jnp.allclose(out2, ref2, atol=1e-5, rtol=1e-5)

    print("KERNEL_OK")
</pallas_src>

<mosaic_0001>
module attributes {stable_mosaic.version = 11 : i64} {
  func.func @_lookup_kernel(%arg0: i32, %arg1: memref<21xf32, #tpu.memory_space<smem>>, %arg2: memref<8x128xi32, #tpu.memory_space<vmem>>, %arg3: memref<8x128xf32, #tpu.memory_space<vmem>>) attributes {dimension_semantics = [#tpu.dimension_semantics<parallel>], iteration_bounds = array<i64: 1>, scalar_prefetch = 0 : i64, scratch_operands = 0 : i64, tpu.core_type = #tpu.core_type<tc>, window_params = [{transform_indices = @transform_0, window_bounds = array<i64: 21>}, {transform_indices = @transform_1, window_bounds = array<i64: 8, 128>}, {transform_indices = @transform_2, window_bounds = array<i64: 8, 128>}]} {
    %c0 = arith.constant 0 : index
    %c0_0 = arith.constant 0 : index
    %0 = vector.load %arg2[%c0, %c0_0] : memref<8x128xi32, #tpu.memory_space<vmem>>, vector<8x128xi32>
    %c0_1 = arith.constant 0 : index
    %1 = memref.load %arg1[%c0_1] : memref<21xf32, #tpu.memory_space<smem>>
    %2 = vector.broadcast %1 : f32 to vector<8x128xf32>
    %c1_i32 = arith.constant 1 : i32
    %3 = vector.broadcast %c1_i32 : i32 to vector<8x128xi32>
    %4 = arith.cmpi eq, %0, %3 : vector<8x128xi32>
    %c1 = arith.constant 1 : index
    %5 = memref.load %arg1[%c1] : memref<21xf32, #tpu.memory_space<smem>>
    %6 = vector.broadcast %5 : f32 to vector<8x128xf32>
    %7 = arith.select %4, %6, %2 : vector<8x128xi1>, vector<8x128xf32>
    %c2_i32 = arith.constant 2 : i32
    %8 = vector.broadcast %c2_i32 : i32 to vector<8x128xi32>
    %9 = arith.cmpi eq, %0, %8 : vector<8x128xi32>
    %c2 = arith.constant 2 : index
    %10 = memref.load %arg1[%c2] : memref<21xf32, #tpu.memory_space<smem>>
    %11 = vector.broadcast %10 : f32 to vector<8x128xf32>
    %12 = arith.select %9, %11, %7 : vector<8x128xi1>, vector<8x128xf32>
    %c3_i32 = arith.constant 3 : i32
    %13 = vector.broadcast %c3_i32 : i32 to vector<8x128xi32>
    %14 = arith.cmpi eq, %0, %13 : vector<8x128xi32>
    %c3 = arith.constant 3 : index
    %15 = memref.load %arg1[%c3] : memref<21xf32, #tpu.memory_space<smem>>
    %16 = vector.broadcast %15 : f32 to vector<8x128xf32>
    %17 = arith.select %14, %16, %12 : vector<8x128xi1>, vector<8x128xf32>
    %c4_i32 = arith.constant 4 : i32
    %18 = vector.broadcast %c4_i32 : i32 to vector<8x128xi32>
    %19 = arith.cmpi eq, %0, %18 : vector<8x128xi32>
    %c4 = arith.constant 4 : index
    %20 = memref.load %arg1[%c4] : memref<21xf32, #tpu.memory_space<smem>>
    %21 = vector.broadcast %20 : f32 to vector<8x128xf32>
    %22 = arith.select %19, %21, %17 : vector<8x128xi1>, vector<8x128xf32>
    %c5_i32 = arith.constant 5 : i32
    %23 = vector.broadcast %c5_i32 : i32 to vector<8x128xi32>
    %24 = arith.cmpi eq, %0, %23 : vector<8x128xi32>
    %c5 = arith.constant 5 : index
    %25 = memref.load %arg1[%c5] : memref<21xf32, #tpu.memory_space<smem>>
    %26 = vector.broadcast %25 : f32 to vector<8x128xf32>
    %27 = arith.select %24, %26, %22 : vector<8x128xi1>, vector<8x128xf32>
    %c6_i32 = arith.constant 6 : i32
    %28 = vector.broadcast %c6_i32 : i32 to vector<8x128xi32>
    %29 = arith.cmpi eq, %0, %28 : vector<8x128xi32>
    %c6 = arith.constant 6 : index
    %30 = memref.load %arg1[%c6] : memref<21xf32, #tpu.memory_space<smem>>
    %31 = vector.broadcast %30 : f32 to vector<8x128xf32>
    %32 = arith.select %29, %31, %27 : vector<8x128xi1>, vector<8x128xf32>
    %c7_i32 = arith.constant 7 : i32
    %33 = vector.broadcast %c7_i32 : i32 to vector<8x128xi32>
    %34 = arith.cmpi eq, %0, %33 : vector<8x128xi32>
    %c7 = arith.constant 7 : index
    %35 = memref.load %arg1[%c7] : memref<21xf32, #tpu.memory_space<smem>>
    %36 = vector.broadcast %35 : f32 to vector<8x128xf32>
    %37 = arith.select %34, %36, %32 : vector<8x128xi1>, vector<8x128xf32>
    %c8_i32 = arith.constant 8 : i32
    %38 = vector.broadcast %c8_i32 : i32 to vector<8x128xi32>
    %39 = arith.cmpi eq, %0, %38 : vector<8x128xi32>
    %c8 = arith.constant 8 : index
    %40 = memref.load %arg1[%c8] : memref<21xf32, #tpu.memory_space<smem>>
    %41 = vector.broadcast %40 : f32 to vector<8x128xf32>
    %42 = arith.select %39, %41, %37 : vector<8x128xi1>, vector<8x128xf32>
    %c9_i32 = arith.constant 9 : i32
    %43 = vector.broadcast %c9_i32 : i32 to vector<8x128xi32>
    %44 = arith.cmpi eq, %0, %43 : vector<8x128xi32>
    %c9 = arith.constant 9 : index
    %45 = memref.load %arg1[%c9] : memref<21xf32, #tpu.memory_space<smem>>
    %46 = vector.broadcast %45 : f32 to vector<8x128xf32>
    %47 = arith.select %44, %46, %42 : vector<8x128xi1>, vector<8x128xf32>
    %c10_i32 = arith.constant 10 : i32
    %48 = vector.broadcast %c10_i32 : i32 to vector<8x128xi32>
    %49 = arith.cmpi eq, %0, %48 : vector<8x128xi32>
    %c10 = arith.constant 10 : index
    %50 = memref.load %arg1[%c10] : memref<21xf32, #tpu.memory_space<smem>>
    %51 = vector.broadcast %50 : f32 to vector<8x128xf32>
    %52 = arith.select %49, %51, %47 : vector<8x128xi1>, vector<8x128xf32>
    %c11_i32 = arith.constant 11 : i32
    %53 = vector.broadcast %c11_i32 : i32 to vector<8x128xi32>
    %54 = arith.cmpi eq, %0, %53 : vector<8x128xi32>
    %c11 = arith.constant 11 : index
    %55 = memref.load %arg1[%c11] : memref<21xf32, #tpu.memory_space<smem>>
    %56 = vector.broadcast %55 : f32 to vector<8x128xf32>
    %57 = arith.select %54, %56, %52 : vector<8x128xi1>, vector<8x128xf32>
    %c12_i32 = arith.constant 12 : i32
    %58 = vector.broadcast %c12_i32 : i32 to vector<8x128xi32>
    %59 = arith.cmpi eq, %0, %58 : vector<8x128xi32>
    %c12 = arith.constant 12 : index
    %60 = memref.load %arg1[%c12] : memref<21xf32, #tpu.memory_space<smem>>
    %61 = vector.broadcast %60 : f32 to vector<8x128xf32>
    %62 = arith.select %59, %61, %57 : vector<8x128xi1>, vector<8x128xf32>
    %c13_i32 = arith.constant 13 : i32
    %63 = vector.broadcast %c13_i32 : i32 to vector<8x128xi32>
    %64 = arith.cmpi eq, %0, %63 : vector<8x128xi32>
    %c13 = arith.constant 13 : index
    %65 = memref.load %arg1[%c13] : memref<21xf32, #tpu.memory_space<smem>>
    %66 = vector.broadcast %65 : f32 to vector<8x128xf32>
    %67 = arith.select %64, %66, %62 : vector<8x128xi1>, vector<8x128xf32>
    %c14_i32 = arith.constant 14 : i32
    %68 = vector.broadcast %c14_i32 : i32 to vector<8x128xi32>
    %69 = arith.cmpi eq, %0, %68 : vector<8x128xi32>
    %c14 = arith.constant 14 : index
    %70 = memref.load %arg1[%c14] : memref<21xf32, #tpu.memory_space<smem>>
    %71 = vector.broadcast %70 : f32 to vector<8x128xf32>
    %72 = arith.select %69, %71, %67 : vector<8x128xi1>, vector<8x128xf32>
    %c15_i32 = arith.constant 15 : i32
    %73 = vector.broadcast %c15_i32 : i32 to vector<8x128xi32>
    %74 = arith.cmpi eq, %0, %73 : vector<8x128xi32>
    %c15 = arith.constant 15 : index
    %75 = memref.load %arg1[%c15] : memref<21xf32, #tpu.memory_space<smem>>
    %76 = vector.broadcast %75 : f32 to vector<8x128xf32>
    %77 = arith.select %74, %76, %72 : vector<8x128xi1>, vector<8x128xf32>
    %c16_i32 = arith.constant 16 : i32
    %78 = vector.broadcast %c16_i32 : i32 to vector<8x128xi32>
    %79 = arith.cmpi eq, %0, %78 : vector<8x128xi32>
    %c16 = arith.constant 16 : index
    %80 = memref.load %arg1[%c16] : memref<21xf32, #tpu.memory_space<smem>>
    %81 = vector.broadcast %80 : f32 to vector<8x128xf32>
    %82 = arith.select %79, %81, %77 : vector<8x128xi1>, vector<8x128xf32>
    %c17_i32 = arith.constant 17 : i32
    %83 = vector.broadcast %c17_i32 : i32 to vector<8x128xi32>
    %84 = arith.cmpi eq, %0, %83 : vector<8x128xi32>
    %c17 = arith.constant 17 : index
    %85 = memref.load %arg1[%c17] : memref<21xf32, #tpu.memory_space<smem>>
    %86 = vector.broadcast %85 : f32 to vector<8x128xf32>
    %87 = arith.select %84, %86, %82 : vector<8x128xi1>, vector<8x128xf32>
    %c18_i32 = arith.constant 18 : i32
    %88 = vector.broadcast %c18_i32 : i32 to vector<8x128xi32>
    %89 = arith.cmpi eq, %0, %88 : vector<8x128xi32>
    %c18 = arith.constant 18 : index
    %90 = memref.load %arg1[%c18] : memref<21xf32, #tpu.memory_space<smem>>
    %91 = vector.broadcast %90 : f32 to vector<8x128xf32>
    %92 = arith.select %89, %91, %87 : vector<8x128xi1>, vector<8x128xf32>
    %c19_i32 = arith.constant 19 : i32
    %93 = vector.broadcast %c19_i32 : i32 to vector<8x128xi32>
    %94 = arith.cmpi eq, %0, %93 : vector<8x128xi32>
    %c19 = arith.constant 19 : index
    %95 = memref.load %arg1[%c19] : memref<21xf32, #tpu.memory_space<smem>>
    %96 = vector.broadcast %95 : f32 to vector<8x128xf32>
    %97 = arith.select %94, %96, %92 : vector<8x128xi1>, vector<8x128xf32>
    %c20_i32 = arith.constant 20 : i32
    %98 = vector.broadcast %c20_i32 : i32 to vector<8x128xi32>
    %99 = arith.cmpi eq, %0, %98 : vector<8x128xi32>
    %c20 = arith.constant 20 : index
    %100 = memref.load %arg1[%c20] : memref<21xf32, #tpu.memory_space<smem>>
    %101 = vector.broadcast %100 : f32 to vector<8x128xf32>
    %102 = arith.select %99, %101, %97 : vector<8x128xi1>, vector<8x128xf32>
    %c0_2 = arith.constant 0 : index
    %c0_3 = arith.constant 0 : index
    %103 = vector.load %arg3[%c0_2, %c0_3] : memref<8x128xf32, #tpu.memory_space<vmem>>, vector<8x128xf32>
    tpu.vector_store %arg3[%c0_2, %c0_3], %102 {strides = array<i32>} : memref<8x128xf32, #tpu.memory_space<vmem>>, vector<8x128xf32>,
    return
  }
  func.func @transform_0(%arg0: i32) -> i32 {
    %c0_i32 = arith.constant 0 : i32
    %c0_i32_0 = arith.constant 0 : i32
    return %c0_i32 : i32
  }
  func.func @transform_1(%arg0: i32) -> (i32, i32) {
    %c0_i32 = arith.constant 0 : i32
    %c0_i32_0 = arith.constant 0 : i32
    return %arg0, %c0_i32 : i32, i32
  }
  func.func @transform_2(%arg0: i32) -> (i32, i32) {
    %c0_i32 = arith.constant 0 : i32
    %c0_i32_0 = arith.constant 0 : i32
    return %arg0, %c0_i32 : i32, i32
  }
}

</mosaic_0001>

<bundles_post_ra>
// kernel: tpu_custom_call.1
= control target key start
LH: loop header
LB: loop body
LE: loop exit
PB: predicated region body
PF: predicated region fallthrough
CT: control target
= control target key end

     0   :  { %7 = vsyncpa [#allocation5], 0  ;;  %s261_s0 = inlined_call_operand.hbm [shape: f32[21], index: 0, kind: input, shape index: {}]   ;;  %s262_s1 = inlined_call_operand.hbm [shape: s32[8,128], index: 1, kind: input, shape index: {}]   ;;  %s263_s2 = inlined_call_operand.hbm [shape: f32[8,128], index: 2, kind: output, shape index: {}]  }
   0x1   :  { %8 = vsyncpa [#allocation3], 0 }
   0x2   :  { %9 = vsyncpa [#allocation4], 0  ;;  %s212_s9 = smov [#allocation2]   ;;  %s213_s12 = smov [#allocation6]  }
   0x3   :  { %17 = dma.hbm_to_smem %s261_s0, 16, %s212_s9, [#allocation5]  }
   0x4   :  { %s24_s13 = sshll.u32 %s213_s12, 4  ;;  %s25_s13 = int_to_ptr.vmem [resolvable:$true] %s24_s13 }
   0x5   :  { %s174_s14 = scalar_lea.vmem %s25_s13, 128  ;;  %p179_p1 = scmp.lt.s32.totalorder %s25_s13, %s25_s13 }
   0x6   :  { %p175_p0 = scmp.ne.s32.totalorder %s25_s13, %s174_s14  ;;  %p180_p2 = scmp.lt.s32.totalorder %s174_s14, %s174_s14 }
   0x8   :  { %p181_p3 = por %p180_p2, %p179_p1 }
   0xa   :  { %p182_p4 = pnand %p181_p3, %p175_p0 }
   0xc   :  { %185 = shalt.err (!%p182_p4)
}
   0xd   :  { %27 = dma.hbm_to_vmem [thread:$0]  %s262_s1, 128, %s25_s13, [#allocation3]  }
   0xe   :  { %206 = dma.done.wait [#allocation5], 16  }
   0xf   :  { %207 = vsyncadd [#allocation5], 4294967280 }
  0x10   :  { %208 = dma.done.wait [#allocation3], 128  }
  0x11   :  { %209 = vsyncadd [#allocation3], 4294967168 }
  0x12   :  { %34 = sfence }
  0x13   :  { %s36_s0 = sld [smem:[#allocation2]]  ;;  %v236_v0 = vld [vmem:[#allocation6] sm:$0xff]  ;;  %s214_s8 = smov [#allocation7]  }
  0x14   :  { %s135_s17 = sld [smem:[#allocation2 + $0x1]]  ;;  %vm38_vm0 = vcmp.eq.s32.totalorder %v236_v0, 1  ;;  %vm42_vm1 = vcmp.eq.s32.totalorder %v236_v0, 2  ;;  %vm46_vm2 = vcmp.eq.s32.totalorder %v236_v0, 3  ;;  %vm50_vm3 = vcmp.eq.s32.totalorder %v236_v0, 4  ;;  %s125_s9 = sshll.u32 %s214_s8, 4  ;;  %s126_s9 = int_to_ptr.vmem [resolvable:$true] %s125_s9 }
  0x15   :  { %s136_s18 = sld [smem:[#allocation2 + $0x2]]  ;;  %vm54_vm4 = vcmp.eq.s32.totalorder %v236_v0, 5  ;;  %vm58_vm5 = vcmp.eq.s32.totalorder %v236_v0, 6  ;;  %vm62_vm6 = vcmp.eq.s32.totalorder %v236_v0, 7  ;;  %vm66_vm7 = vcmp.eq.s32.totalorder %v236_v0, 8  ;;  %s186_s10 = scalar_lea.vmem %s126_s9, 128 }
  0x16   :  { %s137_s19 = sld [smem:[#allocation2 + $0x3]]  ;;  %vm70_vm8 = vcmp.eq.s32.totalorder %v236_v0, 9  ;;  %vm74_vm9 = vcmp.eq.s32.totalorder %v236_v0, 10  ;;  %vm78_vm10 = vcmp.eq.s32.totalorder %v236_v0, 11  ;;  %vm82_vm11 = vcmp.eq.s32.totalorder %v236_v0, 12  ;;  %p187_p5 = scmp.ne.s32.totalorder %s126_s9, %s186_s10 }
  0x17   :  { %s138_s20 = sld [smem:[#allocation2 + $0x4]]  ;;  %vm86_vm12 = vcmp.eq.s32.totalorder %v236_v0, 13  ;;  %vm90_vm13 = vcmp.eq.s32.totalorder %v236_v0, 14  ;;  %vm94_vm14 = vcmp.eq.s32.totalorder %v236_v0, 15  ;;  %vm98_vm15 = vcmp.eq.s32.totalorder %v236_v0, 16  ;;  %p191_p6 = scmp.lt.s32.totalorder %s126_s9, %s126_s9 }
  0x18   :  { %s139_s21 = sld [smem:[#allocation2 + $0x5]]  ;;  %p192_p7 = scmp.lt.s32.totalorder %s186_s10, %s186_s10 }
  0x19   :  { %v37_v1 = vstv %s36_s0  ;;  %s140_s22 = sld [smem:[#allocation2 + $0x6]] }
  0x1a   :  { %v40_v2 = vstv %s135_s17  ;;  %s141_s1 = sld [smem:[#allocation2 + $0x7]]  ;;  %p193_p8 = por %p192_p7, %p191_p6 }
  0x1b   :  { %v41_v3 = vsel %vm38_vm0, %v40_v2, %v37_v1  ;;  %v44_v4 = vstv %s136_s18  ;;  %s142_s23 = sld [smem:[#allocation2 + $0x8]]  ;;  %vm102_vm0 = vcmp.eq.s32.totalorder %v236_v0, 17 }
  0x1c   :  { %v45_v5 = vsel %vm42_vm1, %v44_v4, %v41_v3  ;;  %v48_v6 = vstv %s137_s19  ;;  %s143_s24 = sld [smem:[#allocation2 + $0x9]]  ;;  %vm106_vm1 = vcmp.eq.s32.totalorder %v236_v0, 18  ;;  %p194_p9 = pnand %p193_p8, %p187_p5 }
  0x1d   :  { %v49_v7 = vsel %vm46_vm2, %v48_v6, %v45_v5  ;;  %v52_v8 = vstv %s138_s20  ;;  %s144_s25 = sld [smem:[#allocation2 + $0xa]]  ;;  %vm110_vm2 = vcmp.eq.s32.totalorder %v236_v0, 19 }
  0x1e   :  { %v53_v9 = vsel %vm50_vm3, %v52_v8, %v49_v7  ;;  %v56_v10 = vstv %s139_s21  ;;  %s145_s26 = sld [smem:[#allocation2 + $0xb]]  ;;  %vm114_vm3 = vcmp.eq.s32.totalorder %v236_v0, 20 }
  0x1f   :  { %v57_v11 = vsel %vm54_vm4, %v56_v10, %v53_v9  ;;  %v60_v12 = vstv %s140_s22  ;;  %s146_s27 = sld [smem:[#allocation2 + $0xc]] }
  0x20   :  { %v61_v13 = vsel %vm58_vm5, %v60_v12, %v57_v11  ;;  %v64_v14 = vstv %s141_s1  ;;  %s147_s28 = sld [smem:[#allocation2 + $0xd]] }
  0x21   :  { %v65_v15 = vsel %vm62_vm6, %v64_v14, %v61_v13  ;;  %v68_v16 = vstv %s142_s23  ;;  %s148_s29 = sld [smem:[#allocation2 + $0xe]] }
  0x22   :  { %v69_v17 = vsel %vm66_vm7, %v68_v16, %v65_v15  ;;  %v72_v18 = vstv %s143_s24  ;;  %s149_s30 = sld [smem:[#allocation2 + $0xf]] }
  0x23   :  { %v73_v19 = vsel %vm70_vm8, %v72_v18, %v69_v17  ;;  %v76_v20 = vstv %s144_s25  ;;  %s150_s3 = sld [smem:[#allocation2 + $0x10]] }
  0x24   :  { %v77_v21 = vsel %vm74_vm9, %v76_v20, %v73_v19  ;;  %v80_v22 = vstv %s145_s26  ;;  %s151_s4 = sld [smem:[#allocation2 + $0x11]] }
  0x25   :  { %v81_v23 = vsel %vm78_vm10, %v80_v22, %v77_v21  ;;  %v84_v24 = vstv %s146_s27  ;;  %s152_s5 = sld [smem:[#allocation2 + $0x12]] }
  0x26   :  { %v85_v25 = vsel %vm82_vm11, %v84_v24, %v81_v23  ;;  %v88_v26 = vstv %s147_s28  ;;  %s153_s6 = sld [smem:[#allocation2 + $0x13]] }
  0x27   :  { %v89_v27 = vsel %vm86_vm12, %v88_v26, %v85_v25  ;;  %v92_v28 = vstv %s148_s29  ;;  %s154_s7 = sld [smem:[#allocation2 + $0x14]] }
  0x28   :  { %v93_v29 = vsel %vm90_vm13, %v92_v28, %v89_v27  ;;  %v96_v30 = vstv %s149_s30 }
  0x29   :  { %v97_v31 = vsel %vm94_vm14, %v96_v30, %v93_v29  ;;  %v100_v32 = vstv %s150_s3 }
  0x2a   :  { %v101_v33 = vsel %vm98_vm15, %v100_v32, %v97_v31  ;;  %v104_v34 = vstv %s151_s4 }
  0x2b   :  { %v105_v35 = vsel %vm102_vm0, %v104_v34, %v101_v33  ;;  %v108_v36 = vstv %s152_s5 }
  0x2c   :  { %v109_v37 = vsel %vm106_vm1, %v108_v36, %v105_v35  ;;  %v112_v38 = vstv %s153_s6 }
  0x2d   :  { %v113_v39 = vsel %vm110_vm2, %v112_v38, %v109_v37  ;;  %v116_v40 = vstv %s154_s7 }
  0x2e   :  { %v117_v41 = vsel %vm114_vm3, %v116_v40, %v113_v39 }
  0x2f   :  { %118 = vst [vmem:[#allocation7] sm:$0xff] %v117_v41 }
  0x30   :  { %197 = shalt.err (!%p194_p9)
}
  0x31   :  { %128 = dma.vmem_to_hbm [thread:$0]  %s126_s9, 128, %s263_s2, [#allocation4]  }
  0x32   :  { %210 = dma.done.wait [#allocation4], 128  }
  0x33   :  { %211 = vsyncadd [#allocation4], 4294967168 }
  0x34   :  { %132 = vsyncpa [#allocation3], 1 }
  0x35   :  { %133 = vsyncpa [#allocation4], 1 }
  0x36   :  { %134 = vsyncpa [#allocation5], 1 }

</bundles_post_ra>
